<compile_context>
chip_gen: v7x
topology: tpu7x:2x2x1
jax: 0.10.0
libtpu: 0.0.40
codegen_flags: <defaults>
</compile_context>

<pallas_src>
from functools import lru_cache

import numpy as np

import jax
import jax.numpy as jnp
from jax import lax
from jax.experimental import pallas as pl
from jax.experimental.pallas import tpu as pltpu

MAX_LEN = 80          # tokenizer(..., max_length=80)
SEQ_PAD = 128         # lane-dense padded sequence length (sliced to 80 on host)
BATCH = 8             # minimum sublane-aligned rows per pallas_call
ROW_BLOCK = 512       # row block for the gridded large-batch path
NUM_BYTES = 256       # synthetic "vocab" keyed by byte value

# Synthetic special-token ids (Llama conventions).
UNK_ID = 0
BOS_ID = 1
EOS_ID = 2
PAD_ID = 29871        # id of ' ' (the configured pad_token) in the Llama vocab


def _tokenizer_kernel(bytes_ref, ids_ref):
    """Kernel body (grid-less or one (ROW_BLOCK,128) tile per grid step).

    bytes_ref : VMEM (R, 128) int32 -- column 0 holds n (content-token count),
                columns 1..n hold byte codes, rest are zero
    ids_ref   : VMEM (R, 128) int32 -- output input_ids (columns >= 80 are PAD)
    """
    b = bytes_ref[...]                                   # (R, 128) i32
    n = b[:, 0:1]                                        # (R, 1) content count

    # Synthetic byte -> token-id vocab, closed form on the VPU.
    content_ids = 3 + (b * 7 + 11)

    pos = lax.broadcasted_iota(jnp.int32, b.shape, 1)    # (R, 128)
    # position 0      : BOS
    # positions 1..n  : content token ids
    # position n+1    : EOS   (truncation guarantees n + 1 < MAX_LEN)
    # positions > n+1 : PAD   (padding='max_length'; lane-pad cols also PAD)
    ids = jnp.where(
        pos == 0,
        BOS_ID,
        jnp.where(
            pos <= n,
            content_ids,
            jnp.where(pos == n + 1, EOS_ID, PAD_ID),
        ),
    )
    ids_ref[...] = ids.astype(jnp.int32)


@lru_cache(maxsize=None)
def _build_call(B):
    """One memoized (jit-cached) pallas_call per bucketed batch size."""
    out_shape = jax.ShapeDtypeStruct((B, SEQ_PAD), jnp.int32)
    if B >= 2 * ROW_BLOCK and B % ROW_BLOCK == 0:
        # Large-batch path: parallel row grid (shards across TCs on v7x and
        # keeps the working set per step at one (512,128) tile for v5e VMEM).
        call = pl.pallas_call(
            _tokenizer_kernel,
            out_shape=out_shape,
            grid=(B // ROW_BLOCK,),
            in_specs=[pl.BlockSpec((ROW_BLOCK, SEQ_PAD), lambda i: (i, 0))],
            out_specs=pl.BlockSpec((ROW_BLOCK, SEQ_PAD), lambda i: (i, 0)),
            input_output_aliases={0: 0},
            compiler_params=pltpu.CompilerParams(
                dimension_semantics=("parallel",)),
        )
    else:
        # Small-batch path: grid-less, whole array resident in VMEM.
        call = pl.pallas_call(
            _tokenizer_kernel,
            out_shape=out_shape,
            in_specs=[pl.BlockSpec(memory_space=pltpu.MemorySpace.VMEM)],
            out_specs=pl.BlockSpec(memory_space=pltpu.MemorySpace.VMEM),
            input_output_aliases={0: 0},
        )
    return jax.jit(call)


def _encode_host(text: str):
    """Host-side string prep (no Pallas equivalent for BPE merging)."""
    # TODO(synk): real SentencePiece/BPE merging is string processing with no
    # Pallas equivalent; bytes of the prefixed string stand in for subwords.
    full = "summarize: " + text
    raw = np.frombuffer(full.encode("latin-1", errors="replace"),
                        dtype=np.uint8)
    n = int(min(raw.shape[0], MAX_LEN - 2))      # truncation; room for BOS+EOS
    return raw[:n], n


def _bucket_batch(nb: int) -> int:
    """Round batch up to a power of two >= BATCH (caps distinct compiles)."""
    return max(BATCH, 1 << max(0, nb - 1).bit_length())


def tokenizer_forward(text):
    """JAX/Pallas analog of Tokenizer.forward.

    Accepts a single string (module semantics) or a list of strings (batched,
    amortizes launch overhead across rows of one pallas_call). Returns
    (input_ids [nb, 80] int32 NumPy array, token list(s)).
    """
    single = isinstance(text, str)
    texts = [text] if single else list(text)
    nb = len(texts)
    B = _bucket_batch(nb)

    bytes_host = np.zeros((B, SEQ_PAD), dtype=np.int32)
    raws = []
    for r, t in enumerate(texts):
        raw, n = _encode_host(t)
        raws.append((raw, n))
        bytes_host[r, 0] = n                    # length folded into column 0
        if n:
            bytes_host[r, 1:1 + n] = raw

    ids_padded = _build_call(B)(jnp.asarray(bytes_host))

    # Single D2H copy, then slice in NumPy (no device-side slice dispatch).
    ids_full = np.asarray(jax.device_get(ids_padded))
    ids = ids_full[:nb, :MAX_LEN]               # (nb, 80) int32

    # Host-side glue mirroring convert_ids_to_tokens + '<unk>' filtering.
    # Every content id is >= 14 and BOS/EOS/PAD never equal the '<unk>' id, so
    # the filter keeps all 80 positions -- no extra device readback.
    token_lists = []
    for raw, n in raws:
        chars = raw.tobytes().decode("latin-1")
        pieces = (["<s>"] + list(chars) + ["</s>"]
                  + ["▁"] * (MAX_LEN - n - 2))
        token_lists.append(pieces)

    if single:
        return ids[0:1], token_lists[0]
    return ids, token_lists


if __name__ == "__main__":
    # Deterministic "text" input generated from PRNGKey(0): a short sequence of
    # printable ascii characters (the module's input is a python string).
    key = jax.random.PRNGKey(0)
    codes = jax.random.randint(key, (24,), 97, 123)       # lowercase letters
    text = "".join(chr(int(c)) for c in jax.device_get(codes))

    ids, token_lst = tokenizer_forward(text)
    jax.block_until_ready(ids)

    ids_np = np.asarray(ids)
    n = min(len("summarize: " + text), MAX_LEN - 2)

    assert ids_np.shape == (1, MAX_LEN) and ids_np.dtype == np.int32
    assert ids_np[0, 0] == BOS_ID
    # first content token: 's' of "summarize: "
    assert ids_np[0, 1] == 3 + (ord("s") * 7 + 11)
    assert ids_np[0, n + 1] == EOS_ID
    assert ids_np[0, MAX_LEN - 1] == PAD_ID
    assert len(token_lst) == MAX_LEN
    assert "<unk>" not in token_lst

    print("KERNEL_OK")
</pallas_src>

<mosaic_0001>
module attributes {stable_mosaic.version = 11 : i64} {
  func.func @_tokenizer_kernel(%arg0: memref<8x128xi32, #tpu.memory_space<vmem>>, %arg1: memref<8x128xi32, #tpu.memory_space<vmem>>) attributes {dimension_semantics = [], scalar_prefetch = 0 : i64, scratch_operands = 0 : i64, tpu.core_type = #tpu.core_type<tc>} {
    %c0 = arith.constant 0 : index
    %c0_0 = arith.constant 0 : index
    %0 = vector.load %arg0[%c0, %c0_0] : memref<8x128xi32, #tpu.memory_space<vmem>>, vector<8x128xi32>
    %1 = vector.extract_strided_slice %0 {offsets = [0, 0], sizes = [8, 1], strides = [1, 1]} : vector<8x128xi32> to vector<8x1xi32>
    %c7_i32 = arith.constant 7 : i32
    %2 = vector.broadcast %c7_i32 : i32 to vector<8x128xi32>
    %3 = arith.muli %0, %2 : vector<8x128xi32>
    %c11_i32 = arith.constant 11 : i32
    %4 = vector.broadcast %c11_i32 : i32 to vector<8x128xi32>
    %5 = arith.addi %3, %4 : vector<8x128xi32>
    %c3_i32 = arith.constant 3 : i32
    %6 = vector.broadcast %c3_i32 : i32 to vector<8x128xi32>
    %7 = arith.addi %6, %5 : vector<8x128xi32>
    %8 = tpu.iota {dimensions = array<i32: 1>} : vector<8x128xi32>
    %c0_i32 = arith.constant 0 : i32
    %9 = vector.broadcast %c0_i32 : i32 to vector<8x128xi32>
    %10 = arith.cmpi eq, %8, %9 : vector<8x128xi32>
    %11 = vector.broadcast %1 : vector<8x1xi32> to vector<8x128xi32>
    %12 = arith.cmpi sle, %8, %11 : vector<8x128xi32>
    %c1_i32 = arith.constant 1 : i32
    %13 = vector.broadcast %c1_i32 : i32 to vector<8x1xi32>
    %14 = arith.addi %1, %13 : vector<8x1xi32>
    %15 = vector.broadcast %14 : vector<8x1xi32> to vector<8x128xi32>
    %16 = arith.cmpi eq, %8, %15 : vector<8x128xi32>
    %c2_i32 = arith.constant 2 : i32
    %c29871_i32 = arith.constant 29871 : i32
    %17 = vector.broadcast %c2_i32 : i32 to vector<8x128xi32>
    %18 = vector.broadcast %c29871_i32 : i32 to vector<8x128xi32>
    %19 = arith.select %16, %17, %18 : vector<8x128xi1>, vector<8x128xi32>
    %20 = arith.select %12, %7, %19 : vector<8x128xi1>, vector<8x128xi32>
    %c1_i32_1 = arith.constant 1 : i32
    %21 = vector.broadcast %c1_i32_1 : i32 to vector<8x128xi32>
    %22 = arith.select %10, %21, %20 : vector<8x128xi1>, vector<8x128xi32>
    %c0_2 = arith.constant 0 : index
    %c0_3 = arith.constant 0 : index
    %23 = vector.load %arg1[%c0_2, %c0_3] : memref<8x128xi32, #tpu.memory_space<vmem>>, vector<8x128xi32>
    tpu.vector_store %arg1[%c0_2, %c0_3], %22 {strides = array<i32>} : memref<8x128xi32, #tpu.memory_space<vmem>>, vector<8x128xi32>,
    return
  }
}

</mosaic_0001>

<bundles_post_ra>
// kernel: tpu_custom_call.1
= control target key start
LH: loop header
LB: loop body
LE: loop exit
PB: predicated region body
PF: predicated region fallthrough
CT: control target
= control target key end

     0   :  { %6 = vsyncpa [#allocation3], 0  ;;  %s147_s0 = inlined_call_operand.hbm [shape: s32[8,128], index: 0, kind: input, shape index: {}, may-alias: {0,1}]   ;;  %s148_s1 = inlined_call_operand.hbm [shape: s32[8,128], index: 1, kind: output, shape index: {}, may-alias: {0,1}]  }
   0x1   :  { %7 = vsyncpa [#allocation4], 0  ;;  %s109_s6 = smov [#allocation2]   ;;  %s61_s10 = scalar_lea.hbm %s147_s0, 128 }
   0x2   :  { %s14_s7 = sshll.u32 %s109_s6, 4  ;;  %p62_p0 = scmp.ne.s32.totalorder %s147_s0, %s61_s10  ;;  %s15_s7 = int_to_ptr.vmem [resolvable:$true] %s14_s7 }
   0x3   :  { %p65_p1 = scmp.lt.u32.totalorder %s61_s10, %s147_s0 }
   0x5   :  { %p67_p2 = pnand %p65_p1, %p62_p0 }
   0x7   :  { %70 = shalt.err (!%p67_p2)
}
   0x8   :  { %s71_s15 = scalar_lea.vmem %s15_s7, 128  ;;  %p76_p4 = scmp.lt.s32.totalorder %s15_s7, %s15_s7 }
   0x9   :  { %p72_p3 = scmp.ne.s32.totalorder %s15_s7, %s71_s15  ;;  %p77_p5 = scmp.lt.s32.totalorder %s71_s15, %s71_s15 }
   0xb   :  { %p78_p6 = por %p77_p5, %p76_p4 }
   0xd   :  { %p79_p7 = pnand %p78_p6, %p72_p3 }
   0xf   :  { %82 = shalt.err (!%p79_p7)
}
  0x10   :  { %17 = dma.hbm_to_vmem [thread:$0]  %s147_s0, 128, %s15_s7, [#allocation3]  }
  0x11   :  { %105 = dma.done.wait [#allocation3], 128  }
  0x12   :  { %106 = vsyncadd [#allocation3], 4294967168  ;;  %v110_v0 = vmov 0   ;;  %v21_v1 = vld [vmem:[#allocation2] sm:$0xff]  ;;  %v25_v4 = vlaneseq  ;;  %s111_s18 = smov [#allocation5]   ;;  %v112_v10 = vmov 29871  }
  0x13   :  { %60 = vset.pattern.permute.xlu0 %v110_v0  ;;  %v32_v2 = vadd.s32 1, %v21_v1  ;;  %v22_v3 = vmul.u32 7, %v21_v1  ;;  %s47_s19 = sshll.u32 %s111_s18, 4  ;;  %s48_s19 = int_to_ptr.vmem [resolvable:$true] %s47_s19 }
  0x14   :  { %v26_v6 = vand.u32 127, %v25_v4  ;;  %s83_s0 = scalar_lea.vmem %s48_s19, 128  ;;  %p88_p9 = scmp.lt.s32.totalorder %s48_s19, %s48_s19 }
  0x15   :  { %34 = vperm.xlu0 %60, %v32_v2   ;;  %v23_v5 = vadd.s32 11, %v22_v3  ;;  %p84_p8 = scmp.ne.s32.totalorder %s48_s19, %s83_s0  ;;  %p89_p10 = scmp.lt.s32.totalorder %s83_s0, %s83_s0 }
  0x16   :  { %vm27_vm1 = vcmp.eq.s32.totalorder %v26_v6, 0 }
  0x17   :  { %v24_v8 = vadd.s32 3, %v23_v5  ;;  %p90_p11 = por %p89_p10, %p88_p9 }
  0x19   :  { %29 = vperm.xlu0 %60, %v21_v1   ;;  %p91_p12 = pnand %p90_p11, %p84_p8 }
  0x94   :  { %v35_v7 = vpop.permute.xlu0 %34 }
  0x95   :  { %vm36_vm0 = vcmp.eq.s32.totalorder %v26_v6, %v35_v7 }
  0x96   :  { %v37_v11 = vsel %vm36_vm0, 2, %v112_v10 }
  0x98   :  { %v30_v9 = vpop.permute.xlu0 %29 }
  0x99   :  { %vm31_vm2 = vcmp.le.s32.totalorder %v26_v6, %v30_v9 }
  0x9a   :  { %v38_v12 = vsel %vm31_vm2, %v24_v8, %v37_v11 }
  0x9b   :  { %v39_v13 = vsel %vm27_vm1, 1, %v38_v12 }
  0x9c   :  { %40 = vst [vmem:[#allocation5] sm:$0xff] %v39_v13 }
  0x9d   :  { %94 = shalt.err (!%p91_p12)
}
  0x9e   :  { %s95_s22 = scalar_lea.hbm %s148_s1, 128 }
  0x9f   :  { %p96_p13 = scmp.ne.s32.totalorder %s148_s1, %s95_s22  ;;  %p99_p0 = scmp.lt.u32.totalorder %s95_s22, %s148_s1 }
  0xa1   :  { %p101_p1 = pnand %p99_p0, %p96_p13 }
  0xa3   :  { %104 = shalt.err (!%p101_p1)
}
  0xa4   :  { %50 = dma.vmem_to_hbm [thread:$0]  %s48_s19, 128, %s148_s1, [#allocation4]  }
  0xa5   :  { %107 = dma.done.wait [#allocation4], 128  }
  0xa6   :  { %108 = vsyncadd [#allocation4], 4294967168 }
  0xa7   :  { %54 = vsyncpa [#allocation3], 1 }
  0xa8   :  { %55 = vsyncpa [#allocation4], 1 }

</bundles_post_ra>
